<compile_context>
chip_gen: v5e
topology: v5e:2x2
jax: 0.10.0
libtpu: 0.0.40
codegen_flags: <defaults>
</compile_context>

<pallas_src>
import functools

import jax
import jax.numpy as jnp
from jax.experimental import pallas as pl
from jax.experimental.pallas import tpu as pltpu


# ---------------------------------------------------------------------------
# Kernels
# ---------------------------------------------------------------------------
def _feature_transform_kernel(f_ref, w_ref, o_ref):
    """Z = F @ W  (bf16 x bf16 inputs, f32 accumulate, cast to output dtype)."""
    o_ref[...] = jnp.dot(
        f_ref[...], w_ref[...], preferred_element_type=jnp.float32
    ).astype(o_ref.dtype)


def _aggregate_kernel(a_ref, z_ref, b_ref, o_ref, acc_ref, *, apply_relu):
    """Y[i] = act(sum_k A[i,k] @ Z[k] + b), accumulated over the k grid axis."""
    k = pl.program_id(1)

    @pl.when(k == 0)
    def _():
        acc_ref[...] = jnp.zeros_like(acc_ref)

    acc_ref[...] += jnp.dot(
        a_ref[...], z_ref[...], preferred_element_type=jnp.float32
    )

    @pl.when(k == pl.num_programs(1) - 1)
    def _():
        y = acc_ref[...] + b_ref[...]
        if apply_relu:
            y = jnp.maximum(y, 0.0)
        o_ref[...] = y.astype(o_ref.dtype)


# ---------------------------------------------------------------------------
# pallas_call wrappers
# ---------------------------------------------------------------------------
def _feature_transform(f, w, *, tm):
    n_p, din_p = f.shape
    dout_p = w.shape[1]
    return pl.pallas_call(
        _feature_transform_kernel,
        out_shape=jax.ShapeDtypeStruct((n_p, dout_p), jnp.bfloat16),
        grid=(n_p // tm,),
        in_specs=[
            pl.BlockSpec((tm, din_p), lambda i: (i, 0)),
            pl.BlockSpec((din_p, dout_p), lambda i: (0, 0)),
        ],
        out_specs=pl.BlockSpec((tm, dout_p), lambda i: (i, 0)),
        compiler_params=pltpu.CompilerParams(dimension_semantics=("parallel",)),
    )(f, w)


def _gcn_aggregate(adj, z, b, *, apply_relu, out_dtype, tm, tk):
    n_p = adj.shape[0]
    d = z.shape[1]
    kernel = functools.partial(_aggregate_kernel, apply_relu=apply_relu)
    return pl.pallas_call(
        kernel,
        out_shape=jax.ShapeDtypeStruct((n_p, d), out_dtype),
        grid=(n_p // tm, n_p // tk),
        in_specs=[
            pl.BlockSpec((tm, tk), lambda i, k: (i, k)),   # A_hat tile (streamed)
            pl.BlockSpec((tk, d), lambda i, k: (k, 0)),    # Z tile (streamed)
            pl.BlockSpec((1, d), lambda i, k: (0, 0)),     # bias (resident)
        ],
        out_specs=pl.BlockSpec((tm, d), lambda i, k: (i, 0)),
        scratch_shapes=[pltpu.VMEM((tm, d), jnp.float32)],
        compiler_params=pltpu.CompilerParams(
            dimension_semantics=("parallel", "arbitrary")
        ),
    )(adj, z, b)


# ---------------------------------------------------------------------------
# Glue
# ---------------------------------------------------------------------------
def _round_up(v, m):
    return (v + m - 1) // m * m


def _pad_to(x, rows, cols):
    r, c = x.shape
    return jnp.pad(x, ((0, rows - r), (0, cols - c)))


def _pick_tile(n_p):
    # Largest MXU-friendly tile dividing the padded node count.  Even at 512
    # the double-buffered bf16 A tile + accumulator is only a few MiB, well
    # under every generation's scoped VMEM default (incl. v7x's 64 MiB VMEM).
    for t in (512, 256, 128):
        if n_p % t == 0:
            return t
    return n_p


def build_normalized_adj(edge_index, num_nodes):
    """Dense A_hat = D^{-1/2}(A+I)D^{-1/2}, with A_hat[target, source] (gcn_norm)."""
    # TODO(synk): cache A_hat across forward calls (or build it sparse); this
    # dense O(N^2) scatter-add is plain-XLA glue outside the Pallas kernels.
    src = edge_index[0]
    dst = edge_index[1]
    loops = jnp.arange(num_nodes, dtype=edge_index.dtype)
    src = jnp.concatenate([src, loops])
    dst = jnp.concatenate([dst, loops])
    w = jnp.ones(src.shape[0], dtype=jnp.float32)
    deg = jnp.zeros((num_nodes,), jnp.float32).at[dst].add(w)
    dinv = jnp.where(deg > 0, 1.0 / jnp.sqrt(deg), 0.0)
    norm = dinv[src] * w * dinv[dst]
    adj = jnp.zeros((num_nodes, num_nodes), jnp.float32).at[dst, src].add(norm)
    return adj


@functools.partial(jax.jit, static_argnames=("output_dim",))
def graph_autoencoder_forward(x, edge_index, params, output_dim):
    w1, b1, w2, b2 = params
    n, din = x.shape
    hid = w1.shape[1]

    adj = build_normalized_adj(edge_index, n)

    n_p = _round_up(max(n, 128), 128)   # MXU-aligned contraction / row dim
    din_p = _round_up(din, 128)
    hid_p = _round_up(hid, 128)
    dout_p = _round_up(output_dim, 128)
    tile = _pick_tile(n_p)

    bf16 = jnp.bfloat16
    adj_p = _pad_to(adj, n_p, n_p).astype(bf16)                  # dominant operand: bf16
    x_p = _pad_to(x.astype(jnp.float32), n_p, din_p).astype(bf16)
    w1_p = _pad_to(w1, din_p, hid_p).astype(bf16)
    w2_p = _pad_to(w2, hid_p, dout_p).astype(bf16)
    b1_p = _pad_to(b1.reshape(1, -1).astype(jnp.float32), 1, hid_p)
    b2_p = _pad_to(b2.reshape(1, -1).astype(jnp.float32), 1, dout_p)

    # Encoder: H = relu(A_hat @ (X @ W1) + b1)
    z1 = _feature_transform(x_p, w1_p, tm=tile)
    h = _gcn_aggregate(
        adj_p, z1, b1_p, apply_relu=True, out_dtype=bf16, tm=tile, tk=tile
    )
    # Decoder: OUT = A_hat @ (H @ W2) + b2
    z2 = _feature_transform(h, w2_p, tm=tile)
    out = _gcn_aggregate(
        adj_p, z2, b2_p, apply_relu=False, out_dtype=jnp.float32, tm=tile, tk=tile
    )

    return out[:n, :output_dim]


# ---------------------------------------------------------------------------
# Params + reference
# ---------------------------------------------------------------------------
def init_params(key, input_dim, hidden_dim, output_dim):
    """Glorot-style init matching GCNConv parameter shapes (bias=0)."""
    k1, k2 = jax.random.split(key)
    s1 = jnp.sqrt(6.0 / (input_dim + hidden_dim))
    s2 = jnp.sqrt(6.0 / (hidden_dim + output_dim))
    w1 = jax.random.uniform(k1, (input_dim, hidden_dim), jnp.float32, -s1, s1)
    w2 = jax.random.uniform(k2, (hidden_dim, output_dim), jnp.float32, -s2, s2)
    b1 = jnp.zeros((hidden_dim,), jnp.float32)
    b2 = jnp.zeros((output_dim,), jnp.float32)
    return (w1, b1, w2, b2)


def reference_forward(x, edge_index, params):
    """Pure-JAX mirror of the kernel math: bf16 operands, f32 accumulation."""
    w1, b1, w2, b2 = params
    bf16, f32 = jnp.bfloat16, jnp.float32
    adj = build_normalized_adj(edge_index, x.shape[0]).astype(bf16)
    z1 = jnp.dot(x.astype(bf16), w1.astype(bf16),
                 preferred_element_type=f32).astype(bf16)
    h = jnp.maximum(jnp.dot(adj, z1, preferred_element_type=f32) + b1, 0.0)
    h = h.astype(bf16)
    z2 = jnp.dot(h, w2.astype(bf16), preferred_element_type=f32).astype(bf16)
    return jnp.dot(adj, z2, preferred_element_type=f32) + b2


if __name__ == "__main__":
    key = jax.random.PRNGKey(0)
    input_dim, hidden_dim, output_dim = 16, 32, 16

    # (num_nodes, num_edges): small toy graph + one spanning several grid tiles.
    test_cases = [(64, 256), (300, 1200)]

    for idx, (num_nodes, num_edges) in enumerate(test_cases):
        kx, ke, kp = jax.random.split(jax.random.fold_in(key, idx), 3)
        x = jax.random.normal(kx, (num_nodes, input_dim), jnp.float32)
        edge_index = jax.random.randint(ke, (2, num_edges), 0, num_nodes, jnp.int32)
        params = init_params(kp, input_dim, hidden_dim, output_dim)

        out = graph_autoencoder_forward(x, edge_index, params, output_dim=output_dim)
        out = jax.block_until_ready(out)

        ref = reference_forward(x, edge_index, params)
        assert out.shape == (num_nodes, output_dim)
        assert bool(jnp.all(jnp.isfinite(out)))
        assert jnp.allclose(out, ref, atol=5e-3, rtol=5e-3), (
            f"case {idx}: max abs diff {jnp.max(jnp.abs(out - ref))}"
        )

    print("KERNEL_OK")
</pallas_src>

<mosaic_0001>
module attributes {stable_mosaic.version = 11 : i64} {
  func.func @_feature_transform_kernel(%arg0: i32, %arg1: memref<128x128xbf16, #tpu.memory_space<vmem>>, %arg2: memref<128x128xbf16, #tpu.memory_space<vmem>>, %arg3: memref<128x128xbf16, #tpu.memory_space<vmem>>) attributes {dimension_semantics = [#tpu.dimension_semantics<parallel>], iteration_bounds = array<i64: 1>, scalar_prefetch = 0 : i64, scratch_operands = 0 : i64, tpu.core_type = #tpu.core_type<tc>, window_params = [{transform_indices = @transform_0, window_bounds = array<i64: 128, 128>}, {pipeline_mode = #tpu.pipeline_mode<synchronous>, transform_indices = @transform_1, window_bounds = array<i64: 128, 128>}, {transform_indices = @transform_2, window_bounds = array<i64: 128, 128>}]} {
    %c0 = arith.constant 0 : index
    %c0_0 = arith.constant 0 : index
    %0 = vector.load %arg1[%c0, %c0_0] : memref<128x128xbf16, #tpu.memory_space<vmem>>, vector<128x128xbf16>
    %c0_1 = arith.constant 0 : index
    %c0_2 = arith.constant 0 : index
    %1 = vector.load %arg2[%c0_1, %c0_2] : memref<128x128xbf16, #tpu.memory_space<vmem>>, vector<128x128xbf16>
    %cst = arith.constant dense<0.000000e+00> : vector<128x128xf32>
    %2 = tpu.matmul %0, %1, %cst {dimension_numbers = #tpu.dot_dimension_numbers<[1], [0], [0], [1], [0, 0, 1, 1], [], []>} : vector<128x128xbf16>, vector<128x128xbf16>, vector<128x128xf32> -> vector<128x128xf32>
    %3 = arith.truncf %2 : vector<128x128xf32> to vector<128x128xbf16>
    %c0_3 = arith.constant 0 : index
    %c0_4 = arith.constant 0 : index
    %4 = vector.load %arg3[%c0_3, %c0_4] : memref<128x128xbf16, #tpu.memory_space<vmem>>, vector<128x128xbf16>
    tpu.vector_store %arg3[%c0_3, %c0_4], %3 {strides = array<i32>} : memref<128x128xbf16, #tpu.memory_space<vmem>>, vector<128x128xbf16>,
    return
  }
  func.func @transform_0(%arg0: i32) -> (i32, i32) {
    %c0_i32 = arith.constant 0 : i32
    %c0_i32_0 = arith.constant 0 : i32
    return %arg0, %c0_i32 : i32, i32
  }
  func.func @transform_1(%arg0: i32) -> (i32, i32) {
    %c0_i32 = arith.constant 0 : i32
    %c0_i32_0 = arith.constant 0 : i32
    %c0_i32_1 = arith.constant 0 : i32
    return %c0_i32, %c0_i32_0 : i32, i32
  }
  func.func @transform_2(%arg0: i32) -> (i32, i32) {
    %c0_i32 = arith.constant 0 : i32
    %c0_i32_0 = arith.constant 0 : i32
    return %arg0, %c0_i32 : i32, i32
  }
}

module attributes {stable_mosaic.version = 11 : i64} {
  func.func @_aggregate_kernel(%arg0: i32, %arg1: i32, %arg2: memref<128x128xbf16, #tpu.memory_space<vmem>>, %arg3: memref<128x128xbf16, #tpu.memory_space<vmem>>, %arg4: memref<1x128xf32, #tpu.memory_space<vmem>>, %arg5: memref<128x128xbf16, #tpu.memory_space<vmem>>, %arg6: memref<128x128xf32, #tpu.memory_space<vmem>>) attributes {dimension_semantics = [#tpu.dimension_semantics<parallel>, #tpu.dimension_semantics<arbitrary>], iteration_bounds = array<i64: 1, 1>, scalar_prefetch = 0 : i64, scratch_operands = 1 : i64, tpu.core_type = #tpu.core_type<tc>, window_params = [{transform_indices = @transform_0, window_bounds = array<i64: 128, 128>}, {transform_indices = @transform_1, window_bounds = array<i64: 128, 128>}, {pipeline_mode = #tpu.pipeline_mode<synchronous>, transform_indices = @transform_2, window_bounds = array<i64: 1, 128>}, {transform_indices = @transform_3, window_bounds = array<i64: 128, 128>}]} {
    %c0_i32 = arith.constant 0 : i32
    %0 = arith.cmpi eq, %arg1, %c0_i32 : i32
    %1 = arith.extui %0 : i1 to i32
    %c0_i32_0 = arith.constant 0 : i32
    %2 = arith.cmpi ne, %1, %c0_i32_0 : i32
    scf.if %2 {
      %cst_10 = arith.constant 0.000000e+00 : f32
      %12 = vector.broadcast %cst_10 : f32 to vector<128x128xf32>
      %c0_11 = arith.constant 0 : index
      %c0_12 = arith.constant 0 : index
      %13 = vector.load %arg6[%c0_11, %c0_12] : memref<128x128xf32, #tpu.memory_space<vmem>>, vector<128x128xf32>
      tpu.vector_store %arg6[%c0_11, %c0_12], %12 {strides = array<i32>} : memref<128x128xf32, #tpu.memory_space<vmem>>, vector<128x128xf32>,
    } else {
    }
    %c0 = arith.constant 0 : index
    %c0_1 = arith.constant 0 : index
    %3 = vector.load %arg6[%c0, %c0_1] : memref<128x128xf32, #tpu.memory_space<vmem>>, vector<128x128xf32>
    %c0_2 = arith.constant 0 : index
    %c0_3 = arith.constant 0 : index
    %4 = vector.load %arg2[%c0_2, %c0_3] : memref<128x128xbf16, #tpu.memory_space<vmem>>, vector<128x128xbf16>
    %c0_4 = arith.constant 0 : index
    %c0_5 = arith.constant 0 : index
    %5 = vector.load %arg3[%c0_4, %c0_5] : memref<128x128xbf16, #tpu.memory_space<vmem>>, vector<128x128xbf16>
    %cst = arith.constant dense<0.000000e+00> : vector<128x128xf32>
    %6 = tpu.matmul %4, %5, %cst {dimension_numbers = #tpu.dot_dimension_numbers<[1], [0], [0], [1], [0, 0, 1, 1], [], []>} : vector<128x128xbf16>, vector<128x128xbf16>, vector<128x128xf32> -> vector<128x128xf32>
    %7 = arith.addf %3, %6 : vector<128x128xf32>
    %c0_6 = arith.constant 0 : index
    %c0_7 = arith.constant 0 : index
    %8 = vector.load %arg6[%c0_6, %c0_7] : memref<128x128xf32, #tpu.memory_space<vmem>>, vector<128x128xf32>
    tpu.vector_store %arg6[%c0_6, %c0_7], %7 {strides = array<i32>} : memref<128x128xf32, #tpu.memory_space<vmem>>, vector<128x128xf32>,
    %c0_i32_8 = arith.constant 0 : i32
    %9 = arith.cmpi eq, %arg1, %c0_i32_8 : i32
    %10 = arith.extui %9 : i1 to i32
    %c0_i32_9 = arith.constant 0 : i32
    %11 = arith.cmpi ne, %10, %c0_i32_9 : i32
    scf.if %11 {
      %c0_10 = arith.constant 0 : index
      %c0_11 = arith.constant 0 : index
      %12 = vector.load %arg6[%c0_10, %c0_11] : memref<128x128xf32, #tpu.memory_space<vmem>>, vector<128x128xf32>
      %c0_12 = arith.constant 0 : index
      %c0_13 = arith.constant 0 : index
      %13 = vector.load %arg4[%c0_12, %c0_13] : memref<1x128xf32, #tpu.memory_space<vmem>>, vector<1x128xf32>
      %14 = vector.broadcast %13 : vector<1x128xf32> to vector<128x128xf32>
      %15 = arith.addf %12, %14 : vector<128x128xf32>
      %cst_14 = arith.constant 0.000000e+00 : f32
      %16 = vector.broadcast %cst_14 : f32 to vector<128x128xf32>
      %17 = arith.maximumf %15, %16 : vector<128x128xf32>
      %18 = arith.truncf %17 : vector<128x128xf32> to vector<128x128xbf16>
      %c0_15 = arith.constant 0 : index
      %c0_16 = arith.constant 0 : index
      %19 = vector.load %arg5[%c0_15, %c0_16] : memref<128x128xbf16, #tpu.memory_space<vmem>>, vector<128x128xbf16>
      tpu.vector_store %arg5[%c0_15, %c0_16], %18 {strides = array<i32>} : memref<128x128xbf16, #tpu.memory_space<vmem>>, vector<128x128xbf16>,
    } else {
    }
    return
  }
  func.func @transform_0(%arg0: i32, %arg1: i32) -> (i32, i32) {
    %c0_i32 = arith.constant 0 : i32
    return %arg0, %arg1 : i32, i32
  }
  func.func @transform_1(%arg0: i32, %arg1: i32) -> (i32, i32) {
    %c0_i32 = arith.constant 0 : i32
    %c0_i32_0 = arith.constant 0 : i32
    return %arg1, %c0_i32 : i32, i32
  }
  func.func @transform_2(%arg0: i32, %arg1: i32) -> (i32, i32) {
    %c0_i32 = arith.constant 0 : i32
    %c0_i32_0 = arith.constant 0 : i32
    %c0_i32_1 = arith.constant 0 : i32
    return %c0_i32, %c0_i32_0 : i32, i32
  }
  func.func @transform_3(%arg0: i32, %arg1: i32) -> (i32, i32) {
    %c0_i32 = arith.constant 0 : i32
    %c0_i32_0 = arith.constant 0 : i32
    return %arg0, %c0_i32 : i32, i32
  }
}

module attributes {stable_mosaic.version = 11 : i64} {
  func.func @_aggregate_kernel(%arg0: i32, %arg1: i32, %arg2: memref<128x128xbf16, #tpu.memory_space<vmem>>, %arg3: memref<128x128xbf16, #tpu.memory_space<vmem>>, %arg4: memref<1x128xf32, #tpu.memory_space<vmem>>, %arg5: memref<128x128xf32, #tpu.memory_space<vmem>>, %arg6: memref<128x128xf32, #tpu.memory_space<vmem>>) attributes {dimension_semantics = [#tpu.dimension_semantics<parallel>, #tpu.dimension_semantics<arbitrary>], iteration_bounds = array<i64: 1, 1>, scalar_prefetch = 0 : i64, scratch_operands = 1 : i64, tpu.core_type = #tpu.core_type<tc>, window_params = [{transform_indices = @transform_0, window_bounds = array<i64: 128, 128>}, {transform_indices = @transform_1, window_bounds = array<i64: 128, 128>}, {pipeline_mode = #tpu.pipeline_mode<synchronous>, transform_indices = @transform_2, window_bounds = array<i64: 1, 128>}, {transform_indices = @transform_3, window_bounds = array<i64: 128, 128>}]} {
    %c0_i32 = arith.constant 0 : i32
    %0 = arith.cmpi eq, %arg1, %c0_i32 : i32
    %1 = arith.extui %0 : i1 to i32
    %c0_i32_0 = arith.constant 0 : i32
    %2 = arith.cmpi ne, %1, %c0_i32_0 : i32
    scf.if %2 {
      %cst_10 = arith.constant 0.000000e+00 : f32
      %12 = vector.broadcast %cst_10 : f32 to vector<128x128xf32>
      %c0_11 = arith.constant 0 : index
      %c0_12 = arith.constant 0 : index
      %13 = vector.load %arg6[%c0_11, %c0_12] : memref<128x128xf32, #tpu.memory_space<vmem>>, vector<128x128xf32>
      tpu.vector_store %arg6[%c0_11, %c0_12], %12 {strides = array<i32>} : memref<128x128xf32, #tpu.memory_space<vmem>>, vector<128x128xf32>,
    } else {
    }
    %c0 = arith.constant 0 : index
    %c0_1 = arith.constant 0 : index
    %3 = vector.load %arg6[%c0, %c0_1] : memref<128x128xf32, #tpu.memory_space<vmem>>, vector<128x128xf32>
    %c0_2 = arith.constant 0 : index
    %c0_3 = arith.constant 0 : index
    %4 = vector.load %arg2[%c0_2, %c0_3] : memref<128x128xbf16, #tpu.memory_space<vmem>>, vector<128x128xbf16>
    %c0_4 = arith.constant 0 : index
    %c0_5 = arith.constant 0 : index
    %5 = vector.load %arg3[%c0_4, %c0_5] : memref<128x128xbf16, #tpu.memory_space<vmem>>, vector<128x128xbf16>
    %cst = arith.constant dense<0.000000e+00> : vector<128x128xf32>
    %6 = tpu.matmul %4, %5, %cst {dimension_numbers = #tpu.dot_dimension_numbers<[1], [0], [0], [1], [0, 0, 1, 1], [], []>} : vector<128x128xbf16>, vector<128x128xbf16>, vector<128x128xf32> -> vector<128x128xf32>
    %7 = arith.addf %3, %6 : vector<128x128xf32>
    %c0_6 = arith.constant 0 : index
    %c0_7 = arith.constant 0 : index
    %8 = vector.load %arg6[%c0_6, %c0_7] : memref<128x128xf32, #tpu.memory_space<vmem>>, vector<128x128xf32>
    tpu.vector_store %arg6[%c0_6, %c0_7], %7 {strides = array<i32>} : memref<128x128xf32, #tpu.memory_space<vmem>>, vector<128x128xf32>,
    %c0_i32_8 = arith.constant 0 : i32
    %9 = arith.cmpi eq, %arg1, %c0_i32_8 : i32
    %10 = arith.extui %9 : i1 to i32
    %c0_i32_9 = arith.constant 0 : i32
    %11 = arith.cmpi ne, %10, %c0_i32_9 : i32
    scf.if %11 {
      %c0_10 = arith.constant 0 : index
      %c0_11 = arith.constant 0 : index
      %12 = vector.load %arg6[%c0_10, %c0_11] : memref<128x128xf32, #tpu.memory_space<vmem>>, vector<128x128xf32>
      %c0_12 = arith.constant 0 : index
      %c0_13 = arith.constant 0 : index
      %13 = vector.load %arg4[%c0_12, %c0_13] : memref<1x128xf32, #tpu.memory_space<vmem>>, vector<1x128xf32>
      %14 = vector.broadcast %13 : vector<1x128xf32> to vector<128x128xf32>
      %15 = arith.addf %12, %14 : vector<128x128xf32>
      %c0_14 = arith.constant 0 : index
      %c0_15 = arith.constant 0 : index
      %16 = vector.load %arg5[%c0_14, %c0_15] : memref<128x128xf32, #tpu.memory_space<vmem>>, vector<128x128xf32>
      tpu.vector_store %arg5[%c0_14, %c0_15], %15 {strides = array<i32>} : memref<128x128xf32, #tpu.memory_space<vmem>>, vector<128x128xf32>,
    } else {
    }
    return
  }
  func.func @transform_0(%arg0: i32, %arg1: i32) -> (i32, i32) {
    %c0_i32 = arith.constant 0 : i32
    return %arg0, %arg1 : i32, i32
  }
  func.func @transform_1(%arg0: i32, %arg1: i32) -> (i32, i32) {
    %c0_i32 = arith.constant 0 : i32
    %c0_i32_0 = arith.constant 0 : i32
    return %arg1, %c0_i32 : i32, i32
  }
  func.func @transform_2(%arg0: i32, %arg1: i32) -> (i32, i32) {
    %c0_i32 = arith.constant 0 : i32
    %c0_i32_0 = arith.constant 0 : i32
    %c0_i32_1 = arith.constant 0 : i32
    return %c0_i32, %c0_i32_0 : i32, i32
  }
  func.func @transform_3(%arg0: i32, %arg1: i32) -> (i32, i32) {
    %c0_i32 = arith.constant 0 : i32
    %c0_i32_0 = arith.constant 0 : i32
    return %arg0, %c0_i32 : i32, i32
  }
}

</mosaic_0001>

<bundles_post_ra>
// kernel: graph_autoencoder_forward.4
= control target key start
LH: loop header
LB: loop body
LE: loop exit
PB: predicated region body
PF: predicated region fallthrough
CT: control target
= control target key end

     0   :  { %s462_s1 = inlined_call_operand.vmem [shape: bf16[128,128], index: 1, kind: input, shape index: {}]   ;;  %s463_s0 = inlined_call_operand.vmem [shape: bf16[128,128], index: 0, kind: input, shape index: {}]   ;;  %s464_s2 = inlined_call_operand.vmem [shape: bf16[128,128], index: 2, kind: output, shape index: {}]  }
   0x1   :  { %v303_v0 = vld [vmem:[%s462_s1 + $0x38] sm:$0xff]  ;;  %v302_v1 = vld [vmem:[%s462_s1 + $0x30] sm:$0xff]  ;;  %v301_v2 = vld [vmem:[%s462_s1 + $0x28] sm:$0xff] }
   0x2   :  { %139 = vmatpush.bf16.msra.mxu0 %v303_v0  ;;  %351 = vmatpush.bf16.msra.mxu1 %v303_v0  ;;  %v300_v3 = vld [vmem:[%s462_s1 + $0x20] sm:$0xff]  ;;  %v299_v4 = vld [vmem:[%s462_s1 + $0x18] sm:$0xff]  ;;  %v298_v5 = vld [vmem:[%s462_s1 + $0x10] sm:$0xff] }
   0x3   :  { %352 = vmatpush.bf16.msra.mxu2 %v303_v0  ;;  %353 = vmatpush.bf16.msra.mxu3 %v303_v0  ;;  %v297_v6 = vld [vmem:[%s462_s1 + $0x8] sm:$0xff]  ;;  %v296_v7 = vld [vmem:[%s462_s1] sm:$0xff]  ;;  %v290_v9 = vld [vmem:[%s463_s0 + $0x10] sm:$0xff] }
   0x4   :  { %v288_v8 = vld [vmem:[%s463_s0] sm:$0xff]  ;;  %v294_v11 = vld [vmem:[%s463_s0 + $0x30] sm:$0xff]  ;;  %v289_v12 = vld [vmem:[%s463_s0 + $0x8] sm:$0xff] }
   0x5   :  { %v292_v10 = vld [vmem:[%s463_s0 + $0x20] sm:$0xff]  ;;  %v291_v13 = vld [vmem:[%s463_s0 + $0x18] sm:$0xff]  ;;  %v293_v14 = vld [vmem:[%s463_s0 + $0x28] sm:$0xff] }
   0x6   :  { %140 = vmatpush.bf16.msra.mxu0 %v302_v1  ;;  %354 = vmatpush.bf16.msra.mxu1 %v302_v1  ;;  %v295_v15 = vld [vmem:[%s463_s0 + $0x38] sm:$0xff] }
   0x7   :  { %355 = vmatpush.bf16.msra.mxu2 %v302_v1  ;;  %356 = vmatpush.bf16.msra.mxu3 %v302_v1 }
   0xa   :  { %141 = vmatpush.bf16.msra.mxu0 %v301_v2  ;;  %357 = vmatpush.bf16.msra.mxu1 %v301_v2 }
   0xb   :  { %358 = vmatpush.bf16.msra.mxu2 %v301_v2  ;;  %359 = vmatpush.bf16.msra.mxu3 %v301_v2 }
   0xe   :  { %142 = vmatpush.bf16.msra.mxu0 %v300_v3  ;;  %360 = vmatpush.bf16.msra.mxu1 %v300_v3 }
   0xf   :  { %361 = vmatpush.bf16.msra.mxu2 %v300_v3  ;;  %362 = vmatpush.bf16.msra.mxu3 %v300_v3 }
  0x12   :  { %143 = vmatpush.bf16.msra.mxu0 %v299_v4  ;;  %363 = vmatpush.bf16.msra.mxu1 %v299_v4 }
  0x13   :  { %364 = vmatpush.bf16.msra.mxu2 %v299_v4  ;;  %365 = vmatpush.bf16.msra.mxu3 %v299_v4 }
  0x16   :  { %144 = vmatpush.bf16.msra.mxu0 %v298_v5  ;;  %366 = vmatpush.bf16.msra.mxu1 %v298_v5 }
  0x17   :  { %367 = vmatpush.bf16.msra.mxu2 %v298_v5  ;;  %368 = vmatpush.bf16.msra.mxu3 %v298_v5 }
  0x1a   :  { %145 = vmatpush.bf16.msra.mxu0 %v297_v6  ;;  %369 = vmatpush.bf16.msra.mxu1 %v297_v6 }
  0x1b   :  { %370 = vmatpush.bf16.msra.mxu2 %v297_v6  ;;  %371 = vmatpush.bf16.msra.mxu3 %v297_v6 }
  0x1e   :  { %146 = vmatpush.bf16.msra.mxu0 %v296_v7  ;;  %372 = vmatpush.bf16.msra.mxu1 %v296_v7 }
  0x1f   :  { %373 = vmatpush.bf16.msra.mxu2 %v296_v7  ;;  %374 = vmatpush.bf16.msra.mxu3 %v296_v7 }
  0x21   :  { %147 = vmatmul.bf16.vlgmr.msra.gmra.mxu0 %v288_v8  ;;  %157 = vmatmul.bf16.vlgmr.msra.gmra.mxu1 %v290_v9 }
  0x22   :  { %167 = vmatmul.bf16.vlgmr.msra.gmra.mxu2 %v292_v10  ;;  %177 = vmatmul.bf16.vlgmr.msra.gmra.mxu3 %v294_v11 }
  0x31   :  { %152 = vmatmul.bf16.gmra.mxu0 %v289_v12  ;;  %162 = vmatmul.bf16.gmra.mxu1 %v291_v13 }
  0x32   :  { %172 = vmatmul.bf16.gmra.mxu2 %v293_v14  ;;  %182 = vmatmul.bf16.gmra.mxu3 %v295_v15 }
  0x9e   :  { %v148_v16 = vpop.f32.mrf.mxu0  ;;  %v158_v17 = vpop.f32.mrf.mxu1 }
  0xa5   :  { %v168_v18 = vpop.f32.mrf.mxu2  ;;  %v178_v19 = vpop.f32.mrf.mxu3 }
  0xa6   :  { %v150_v20 = vpop.f32.mrf.mxu0  ;;  %v160_v21 = vpop.f32.mrf.mxu1 }
  0xa7   :  { %v307_v22 = vpack.c.bf16 %v150_v20, %v148_v16  ;;  %v317_v23 = vpack.c.bf16 %v160_v21, %v158_v17 }
  0xa9   :  { %308 = vst [vmem:[%s464_s2] sm:$0xff] %v307_v22  }
  0xaa   :  { %345 = vst [vmem:[%s464_s2 + $0x10] sm:$0xff] %v317_v23  }
  0xad   :  { %v170_v24 = vpop.f32.mrf.mxu2  ;;  %v180_v25 = vpop.f32.mrf.mxu3 }
  0xae   :  { %v327_v26 = vpack.c.bf16 %v170_v24, %v168_v18  ;;  %v337_v27 = vpack.c.bf16 %v180_v25, %v178_v19  ;;  %v153_v28 = vpop.f32.mrf.mxu0  ;;  %v163_v29 = vpop.f32.mrf.mxu1 }
  0xb0   :  { %347 = vst [vmem:[%s464_s2 + $0x20] sm:$0xff] %v327_v26  }
  0xb1   :  { %349 = vst [vmem:[%s464_s2 + $0x30] sm:$0xff] %v337_v27  }
  0xb5   :  { %v173_v30 = vpop.f32.mrf.mxu2  ;;  %v183_v31 = vpop.f32.mrf.mxu3 }
  0xb6   :  { %v155_v32 = vpop.f32.mrf.mxu0  ;;  %v165_v33 = vpop.f32.mrf.mxu1 }
  0xb7   :  { %v312_v34 = vpack.c.bf16 %v155_v32, %v153_v28  ;;  %v322_v35 = vpack.c.bf16 %v165_v33, %v163_v29 }
  0xb9   :  { %344 = vst [vmem:[%s464_s2 + $0x8] sm:$0xff] %v312_v34  }
  0xba   :  { %346 = vst [vmem:[%s464_s2 + $0x18] sm:$0xff] %v322_v35  }
  0xbd   :  { %v175_v36 = vpop.f32.mrf.mxu2  ;;  %v185_v37 = vpop.f32.mrf.mxu3 }
  0xbe   :  { %v332_v38 = vpack.c.bf16 %v175_v36, %v173_v30  ;;  %v342_v39 = vpack.c.bf16 %v185_v37, %v183_v31 }
  0xc0   :  { %348 = vst [vmem:[%s464_s2 + $0x28] sm:$0xff] %v332_v38  }
  0xc1   :  { %350 = vst [vmem:[%s464_s2 + $0x38] sm:$0xff] %v342_v39  }

// kernel: graph_autoencoder_forward.5
= control target key start
LH: loop header
LB: loop body
LE: loop exit
PB: predicated region body
PF: predicated region fallthrough
CT: control target
= control target key end

     0   :  { %s597_s1 = inlined_call_operand.vmem [shape: bf16[128,128], index: 1, kind: input, shape index: {}]   ;;  %s598_s2 = inlined_call_operand.vmem [shape: f32[1,128], index: 2, kind: input, shape index: {}]   ;;  %s599_s0 = inlined_call_operand.vmem [shape: bf16[128,128], index: 0, kind: input, shape index: {}]   ;;  %s600_s3 = inlined_call_operand.vmem [shape: bf16[128,128], index: 3, kind: output, shape index: {}]  }
   0x1   :  { %v429_v0 = vld [vmem:[%s597_s1 + $0x38] sm:$0xff]  ;;  %v428_v1 = vld [vmem:[%s597_s1 + $0x30] sm:$0xff]  ;;  %v427_v2 = vld [vmem:[%s597_s1 + $0x28] sm:$0xff] }
   0x2   :  { %178 = vmatpush.bf16.msra.mxu0 %v429_v0  ;;  %477 = vmatpush.bf16.msra.mxu1 %v429_v0  ;;  %v426_v3 = vld [vmem:[%s597_s1 + $0x20] sm:$0xff]  ;;  %v425_v4 = vld [vmem:[%s597_s1 + $0x18] sm:$0xff]  ;;  %v424_v5 = vld [vmem:[%s597_s1 + $0x10] sm:$0xff] }
   0x3   :  { %478 = vmatpush.bf16.msra.mxu2 %v429_v0  ;;  %479 = vmatpush.bf16.msra.mxu3 %v429_v0  ;;  %v423_v6 = vld [vmem:[%s597_s1 + $0x8] sm:$0xff]  ;;  %v422_v7 = vld [vmem:[%s597_s1] sm:$0xff]  ;;  %v416_v9 = vld [vmem:[%s599_s0 + $0x10] sm:$0xff] }
   0x4   :  { %v414_v8 = vld [vmem:[%s599_s0] sm:$0xff]  ;;  %v420_v11 = vld [vmem:[%s599_s0 + $0x30] sm:$0xff]  ;;  %v415_v12 = vld [vmem:[%s599_s0 + $0x8] sm:$0xff] }
   0x5   :  { %v418_v10 = vld [vmem:[%s599_s0 + $0x20] sm:$0xff]  ;;  %v417_v13 = vld [vmem:[%s599_s0 + $0x18] sm:$0xff]  ;;  %v419_v14 = vld [vmem:[%s599_s0 + $0x28] sm:$0xff] }
   0x6   :  { %179 = vmatpush.bf16.msra.mxu0 %v428_v1  ;;  %480 = vmatpush.bf16.msra.mxu1 %v428_v1  ;;  %v421_v15 = vld [vmem:[%s599_s0 + $0x38] sm:$0xff]  ;;  %v501_v18 = vld [vmem:[%s598_s2] ss:$0 sm:$0xff] }
   0x7   :  { %481 = vmatpush.bf16.msra.mxu2 %v428_v1  ;;  %482 = vmatpush.bf16.msra.mxu3 %v428_v1 }
   0xa   :  { %180 = vmatpush.bf16.msra.mxu0 %v427_v2  ;;  %483 = vmatpush.bf16.msra.mxu1 %v427_v2 }
   0xb   :  { %484 = vmatpush.bf16.msra.mxu2 %v427_v2  ;;  %485 = vmatpush.bf16.msra.mxu3 %v427_v2 }
   0xe   :  { %181 = vmatpush.bf16.msra.mxu0 %v426_v3  ;;  %486 = vmatpush.bf16.msra.mxu1 %v426_v3 }
   0xf   :  { %487 = vmatpush.bf16.msra.mxu2 %v426_v3  ;;  %488 = vmatpush.bf16.msra.mxu3 %v426_v3 }
  0x12   :  { %182 = vmatpush.bf16.msra.mxu0 %v425_v4  ;;  %489 = vmatpush.bf16.msra.mxu1 %v425_v4 }
  0x13   :  { %490 = vmatpush.bf16.msra.mxu2 %v425_v4  ;;  %491 = vmatpush.bf16.msra.mxu3 %v425_v4 }
  0x16   :  { %183 = vmatpush.bf16.msra.mxu0 %v424_v5  ;;  %492 = vmatpush.bf16.msra.mxu1 %v424_v5 }
  0x17   :  { %493 = vmatpush.bf16.msra.mxu2 %v424_v5  ;;  %494 = vmatpush.bf16.msra.mxu3 %v424_v5 }
  0x1a   :  { %184 = vmatpush.bf16.msra.mxu0 %v423_v6  ;;  %495 = vmatpush.bf16.msra.mxu1 %v423_v6 }
  0x1b   :  { %496 = vmatpush.bf16.msra.mxu2 %v423_v6  ;;  %497 = vmatpush.bf16.msra.mxu3 %v423_v6 }
  0x1e   :  { %185 = vmatpush.bf16.msra.mxu0 %v422_v7  ;;  %498 = vmatpush.bf16.msra.mxu1 %v422_v7 }
  0x1f   :  { %499 = vmatpush.bf16.msra.mxu2 %v422_v7  ;;  %500 = vmatpush.bf16.msra.mxu3 %v422_v7 }
  0x21   :  { %186 = vmatmul.bf16.vlgmr.msra.gmra.mxu0 %v414_v8  ;;  %196 = vmatmul.bf16.vlgmr.msra.gmra.mxu1 %v416_v9 }
  0x22   :  { %206 = vmatmul.bf16.vlgmr.msra.gmra.mxu2 %v418_v10  ;;  %216 = vmatmul.bf16.vlgmr.msra.gmra.mxu3 %v420_v11 }
  0x31   :  { %191 = vmatmul.bf16.gmra.mxu0 %v415_v12  ;;  %201 = vmatmul.bf16.gmra.mxu1 %v417_v13 }
  0x32   :  { %211 = vmatmul.bf16.gmra.mxu2 %v419_v14  ;;  %221 = vmatmul.bf16.gmra.mxu3 %v421_v15 }
  0x9e   :  { %v187_v16 = vpop.f32.mrf.mxu0  ;;  %v197_v17 = vpop.f32.mrf.mxu1 }
  0x9f   :  { %v282_v19 = vadd.f32 %v501_v18, %v187_v16  ;;  %v286_v20 = vadd.f32 %v501_v18, %v197_v17 }
  0xa1   :  { %v298_v27 = vmax.f32 %v282_v19, 0.0  ;;  %v302_v28 = vmax.f32 %v286_v20, 0.0 }
  0xa5   :  { %v207_v21 = vpop.f32.mrf.mxu2  ;;  %v217_v22 = vpop.f32.mrf.mxu3 }
  0xa6   :  { %v189_v23 = vpop.f32.mrf.mxu0  ;;  %v199_v24 = vpop.f32.mrf.mxu1  ;;  %v290_v33 = vadd.f32 %v501_v18, %v207_v21  ;;  %v294_v34 = vadd.f32 %v501_v18, %v217_v22 }
  0xa7   :  { %v283_v25 = vadd.f32 %v501_v18, %v189_v23  ;;  %v287_v26 = vadd.f32 %v501_v18, %v199_v24 }
  0xa8   :  { %v306_v41 = vmax.f32 %v290_v33, 0.0  ;;  %v310_v42 = vmax.f32 %v294_v34, 0.0 }
  0xa9   :  { %v299_v29 = vmax.f32 %v283_v25, 0.0  ;;  %v303_v30 = vmax.f32 %v287_v26, 0.0 }
  0xab   :  { %v433_v31 = vpack.c.bf16 %v299_v29, %v298_v27  ;;  %v443_v32 = vpack.c.bf16 %v303_v30, %v302_v28 }
  0xad   :  { %434 = vst [vmem:[%s600_s3] sm:$0xff] %v433_v31   ;;  %v209_v35 = vpop.f32.mrf.mxu2  ;;  %v219_v36 = vpop.f32.mrf.mxu3 }
  0xae   :  { %471 = vst [vmem:[%s600_s3 + $0x10] sm:$0xff] %v443_v32   ;;  %v291_v37 = vadd.f32 %v501_v18, %v209_v35  ;;  %v295_v38 = vadd.f32 %v501_v18, %v219_v36  ;;  %v192_v39 = vpop.f32.mrf.mxu0  ;;  %v202_v40 = vpop.f32.mrf.mxu1 }
  0xaf   :  { %v284_v47 = vadd.f32 %v501_v18, %v192_v39  ;;  %v288_v48 = vadd.f32 %v501_v18, %v202_v40 }
  0xb0   :  { %v307_v43 = vmax.f32 %v291_v37, 0.0  ;;  %v311_v44 = vmax.f32 %v295_v38, 0.0 }
  0xb1   :  { %v300_v55 = vmax.f32 %v284_v47, 0.0  ;;  %v304_v56 = vmax.f32 %v288_v48, 0.0 }
  0xb2   :  { %v453_v45 = vpack.c.bf16 %v307_v43, %v306_v41  ;;  %v463_v46 = vpack.c.bf16 %v311_v44, %v310_v42 }
  0xb4   :  { %473 = vst [vmem:[%s600_s3 + $0x20] sm:$0xff] %v453_v45  }
  0xb5   :  { %475 = vst [vmem:[%s600_s3 + $0x30] sm:$0xff] %v463_v46   ;;  %v212_v49 = vpop.f32.mrf.mxu2  ;;  %v222_v50 = vpop.f32.mrf.mxu3 }
  0xb6   :  { %v194_v51 = vpop.f32.mrf.mxu0  ;;  %v204_v52 = vpop.f32.mrf.mxu1  ;;  %v292_v61 = vadd.f32 %v501_v18, %v212_v49  ;;  %v296_v62 = vadd.f32 %v501_v18, %v222_v50 }
  0xb7   :  { %v285_v53 = vadd.f32 %v501_v18, %v194_v51  ;;  %v289_v54 = vadd.f32 %v501_v18, %v204_v52 }
  0xb8   :  { %v308_v3 = vmax.f32 %v292_v61, 0.0  ;;  %v312_v4 = vmax.f32 %v296_v62, 0.0 }
  0xb9   :  { %v301_v57 = vmax.f32 %v285_v53, 0.0  ;;  %v305_v58 = vmax.f32 %v289_v54, 0.0 }
  0xbb   :  { %v438_v59 = vpack.c.bf16 %v301_v57, %v300_v55  ;;  %v448_v60 = vpack.c.bf16 %v305_v58, %v304_v56 }
  0xbd   :  { %470 = vst [vmem:[%s600_s3 + $0x8] sm:$0xff] %v438_v59   ;;  %v214_v63 = vpop.f32.mrf.mxu2  ;;  %v224_v0 = vpop.f32.mrf.mxu3 }
  0xbe   :  { %472 = vst [vmem:[%s600_s3 + $0x18] sm:$0xff] %v448_v60   ;;  %v293_v1 = vadd.f32 %v501_v18, %v214_v63  ;;  %v297_v2 = vadd.f32 %v501_v18, %v224_v0 }
  0xc0   :  { %v309_v5 = vmax.f32 %v293_v1, 0.0  ;;  %v313_v6 = vmax.f32 %v297_v2, 0.0 }
  0xc2   :  { %v458_v7 = vpack.c.bf16 %v309_v5, %v308_v3  ;;  %v468_v8 = vpack.c.bf16 %v313_v6, %v312_v4 }
  0xc4   :  { %474 = vst [vmem:[%s600_s3 + $0x28] sm:$0xff] %v458_v7  }
  0xc5   :  { %476 = vst [vmem:[%s600_s3 + $0x38] sm:$0xff] %v468_v8  }

// kernel: graph_autoencoder_forward.7
= control target key start
LH: loop header
LB: loop body
LE: loop exit
PB: predicated region body
PF: predicated region fallthrough
CT: control target
= control target key end

     0   :  { %s542_s1 = inlined_call_operand.vmem [shape: bf16[128,128], index: 1, kind: input, shape index: {}]   ;;  %s543_s2 = inlined_call_operand.vmem [shape: f32[1,128], index: 2, kind: input, shape index: {}]   ;;  %s544_s0 = inlined_call_operand.vmem [shape: bf16[128,128], index: 0, kind: input, shape index: {}]   ;;  %s545_s3 = inlined_call_operand.vmem [shape: f32[128,128], index: 3, kind: output, shape index: {}]  }
   0x1   :  { %v397_v0 = vld [vmem:[%s542_s1 + $0x38] sm:$0xff]  ;;  %v396_v1 = vld [vmem:[%s542_s1 + $0x30] sm:$0xff]  ;;  %v395_v2 = vld [vmem:[%s542_s1 + $0x28] sm:$0xff] }
   0x2   :  { %178 = vmatpush.bf16.msra.mxu0 %v397_v0  ;;  %398 = vmatpush.bf16.msra.mxu1 %v397_v0  ;;  %v394_v3 = vld [vmem:[%s542_s1 + $0x20] sm:$0xff]  ;;  %v393_v4 = vld [vmem:[%s542_s1 + $0x18] sm:$0xff]  ;;  %v392_v5 = vld [vmem:[%s542_s1 + $0x10] sm:$0xff] }
   0x3   :  { %399 = vmatpush.bf16.msra.mxu2 %v397_v0  ;;  %400 = vmatpush.bf16.msra.mxu3 %v397_v0  ;;  %v391_v6 = vld [vmem:[%s542_s1 + $0x8] sm:$0xff]  ;;  %v390_v7 = vld [vmem:[%s542_s1] sm:$0xff]  ;;  %v384_v9 = vld [vmem:[%s544_s0 + $0x10] sm:$0xff] }
   0x4   :  { %v382_v8 = vld [vmem:[%s544_s0] sm:$0xff]  ;;  %v388_v11 = vld [vmem:[%s544_s0 + $0x30] sm:$0xff]  ;;  %v383_v12 = vld [vmem:[%s544_s0 + $0x8] sm:$0xff] }
   0x5   :  { %v386_v10 = vld [vmem:[%s544_s0 + $0x20] sm:$0xff]  ;;  %v385_v13 = vld [vmem:[%s544_s0 + $0x18] sm:$0xff]  ;;  %v387_v14 = vld [vmem:[%s544_s0 + $0x28] sm:$0xff] }
   0x6   :  { %179 = vmatpush.bf16.msra.mxu0 %v396_v1  ;;  %401 = vmatpush.bf16.msra.mxu1 %v396_v1  ;;  %v389_v15 = vld [vmem:[%s544_s0 + $0x38] sm:$0xff]  ;;  %v422_v16 = vld [vmem:[%s543_s2] ss:$0 sm:$0xff] }
   0x7   :  { %402 = vmatpush.bf16.msra.mxu2 %v396_v1  ;;  %403 = vmatpush.bf16.msra.mxu3 %v396_v1 }
   0xa   :  { %180 = vmatpush.bf16.msra.mxu0 %v395_v2  ;;  %404 = vmatpush.bf16.msra.mxu1 %v395_v2 }
   0xb   :  { %405 = vmatpush.bf16.msra.mxu2 %v395_v2  ;;  %406 = vmatpush.bf16.msra.mxu3 %v395_v2 }
   0xe   :  { %181 = vmatpush.bf16.msra.mxu0 %v394_v3  ;;  %407 = vmatpush.bf16.msra.mxu1 %v394_v3 }
   0xf   :  { %408 = vmatpush.bf16.msra.mxu2 %v394_v3  ;;  %409 = vmatpush.bf16.msra.mxu3 %v394_v3 }
  0x12   :  { %182 = vmatpush.bf16.msra.mxu0 %v393_v4  ;;  %410 = vmatpush.bf16.msra.mxu1 %v393_v4 }
  0x13   :  { %411 = vmatpush.bf16.msra.mxu2 %v393_v4  ;;  %412 = vmatpush.bf16.msra.mxu3 %v393_v4 }
  0x16   :  { %183 = vmatpush.bf16.msra.mxu0 %v392_v5  ;;  %413 = vmatpush.bf16.msra.mxu1 %v392_v5 }
  0x17   :  { %414 = vmatpush.bf16.msra.mxu2 %v392_v5  ;;  %415 = vmatpush.bf16.msra.mxu3 %v392_v5 }
  0x1a   :  { %184 = vmatpush.bf16.msra.mxu0 %v391_v6  ;;  %416 = vmatpush.bf16.msra.mxu1 %v391_v6 }
  0x1b   :  { %417 = vmatpush.bf16.msra.mxu2 %v391_v6  ;;  %418 = vmatpush.bf16.msra.mxu3 %v391_v6 }
  0x1e   :  { %185 = vmatpush.bf16.msra.mxu0 %v390_v7  ;;  %419 = vmatpush.bf16.msra.mxu1 %v390_v7 }
  0x1f   :  { %420 = vmatpush.bf16.msra.mxu2 %v390_v7  ;;  %421 = vmatpush.bf16.msra.mxu3 %v390_v7 }
  0x21   :  { %186 = vmatmul.bf16.vlgmr.msra.gmra.mxu0 %v382_v8  ;;  %196 = vmatmul.bf16.vlgmr.msra.gmra.mxu1 %v384_v9 }
  0x22   :  { %206 = vmatmul.bf16.vlgmr.msra.gmra.mxu2 %v386_v10  ;;  %216 = vmatmul.bf16.vlgmr.msra.gmra.mxu3 %v388_v11 }
  0x31   :  { %191 = vmatmul.bf16.gmra.mxu0 %v383_v12  ;;  %201 = vmatmul.bf16.gmra.mxu1 %v385_v13 }
  0x32   :  { %211 = vmatmul.bf16.gmra.mxu2 %v387_v14  ;;  %221 = vmatmul.bf16.gmra.mxu3 %v389_v15 }
  0x9e   :  { %v187_v17 = vpop.f32.mrf.mxu0  ;;  %v197_v18 = vpop.f32.mrf.mxu1 }
  0x9f   :  { %v282_v19 = vadd.f32 %v422_v16, %v187_v17  ;;  %v286_v20 = vadd.f32 %v422_v16, %v197_v18 }
  0xa1   :  { %298 = vst [vmem:[%s545_s3] sm:$0xff] %v282_v19 }
  0xa2   :  { %302 = vst [vmem:[%s545_s3 + $0x20] sm:$0xff] %v286_v20 }
  0xa5   :  { %v207_v21 = vpop.f32.mrf.mxu2  ;;  %v217_v22 = vpop.f32.mrf.mxu3 }
  0xa6   :  { %v290_v23 = vadd.f32 %v422_v16, %v207_v21  ;;  %v294_v24 = vadd.f32 %v422_v16, %v217_v22  ;;  %v189_v25 = vpop.f32.mrf.mxu0  ;;  %v199_v26 = vpop.f32.mrf.mxu1 }
  0xa7   :  { %v283_v27 = vadd.f32 %v422_v16, %v189_v25  ;;  %v287_v28 = vadd.f32 %v422_v16, %v199_v26 }
  0xa8   :  { %306 = vst [vmem:[%s545_s3 + $0x40] sm:$0xff] %v290_v23 }
  0xa9   :  { %310 = vst [vmem:[%s545_s3 + $0x60] sm:$0xff] %v294_v24 }
  0xaa   :  { %299 = vst [vmem:[%s545_s3 + $0x8] sm:$0xff] %v283_v27 }
  0xab   :  { %303 = vst [vmem:[%s545_s3 + $0x28] sm:$0xff] %v287_v28 }
  0xad   :  { %v209_v29 = vpop.f32.mrf.mxu2  ;;  %v219_v30 = vpop.f32.mrf.mxu3 }
  0xae   :  { %v291_v31 = vadd.f32 %v422_v16, %v209_v29  ;;  %v295_v32 = vadd.f32 %v422_v16, %v219_v30  ;;  %v192_v33 = vpop.f32.mrf.mxu0  ;;  %v202_v34 = vpop.f32.mrf.mxu1 }
  0xaf   :  { %v284_v35 = vadd.f32 %v422_v16, %v192_v33  ;;  %v288_v36 = vadd.f32 %v422_v16, %v202_v34 }
  0xb0   :  { %307 = vst [vmem:[%s545_s3 + $0x48] sm:$0xff] %v291_v31 }
  0xb1   :  { %311 = vst [vmem:[%s545_s3 + $0x68] sm:$0xff] %v295_v32 }
  0xb2   :  { %300 = vst [vmem:[%s545_s3 + $0x10] sm:$0xff] %v284_v35 }
  0xb3   :  { %304 = vst [vmem:[%s545_s3 + $0x30] sm:$0xff] %v288_v36 }
  0xb5   :  { %v212_v37 = vpop.f32.mrf.mxu2  ;;  %v222_v38 = vpop.f32.mrf.mxu3 }
  0xb6   :  { %v292_v39 = vadd.f32 %v422_v16, %v212_v37  ;;  %v296_v40 = vadd.f32 %v422_v16, %v222_v38  ;;  %v194_v41 = vpop.f32.mrf.mxu0  ;;  %v204_v42 = vpop.f32.mrf.mxu1 }
  0xb7   :  { %v285_v43 = vadd.f32 %v422_v16, %v194_v41  ;;  %v289_v44 = vadd.f32 %v422_v16, %v204_v42 }
  0xb8   :  { %308 = vst [vmem:[%s545_s3 + $0x50] sm:$0xff] %v292_v39 }
  0xb9   :  { %312 = vst [vmem:[%s545_s3 + $0x70] sm:$0xff] %v296_v40 }
  0xba   :  { %301 = vst [vmem:[%s545_s3 + $0x18] sm:$0xff] %v285_v43 }
  0xbb   :  { %305 = vst [vmem:[%s545_s3 + $0x38] sm:$0xff] %v289_v44 }
  0xbd   :  { %v214_v45 = vpop.f32.mrf.mxu2  ;;  %v224_v46 = vpop.f32.mrf.mxu3 }
  0xbe   :  { %v293_v47 = vadd.f32 %v422_v16, %v214_v45  ;;  %v297_v48 = vadd.f32 %v422_v16, %v224_v46 }
  0xc0   :  { %309 = vst [vmem:[%s545_s3 + $0x58] sm:$0xff] %v293_v47 }
  0xc1   :  { %313 = vst [vmem:[%s545_s3 + $0x78] sm:$0xff] %v297_v48 }

</bundles_post_ra>
